<compile_context>
chip_gen: v7x
topology: tpu7x:2x2x1
jax: 0.10.0
libtpu: 0.0.40
codegen_flags: <defaults>
</compile_context>

<pallas_src>
import functools
import math

import jax
import jax.numpy as jnp
from jax.experimental import pallas as pl
from jax.experimental.pallas import tpu as pltpu

LANE = 128


# ------------------------- small static helpers -------------------------

def _cdiv(a, b):
    return -(-a // b)


def _round_down(x, m):
    return (x // m) * m


def _itemsize(dtype):
    return jnp.dtype(dtype).itemsize


def _sublane_align(dtype):
    # sub-32-bit dtypes pack along sublanes: 16 rows for 2-byte, 32 for 1-byte
    return {4: 8, 2: 16, 1: 32}.get(_itemsize(dtype), 8)


def _as_2d(x):
    """Free (metadata-only, no pad/copy) reshape to (rows, width); width is the
    smallest trailing-suffix product >= 128 so lanes stay dense."""
    if x.ndim == 0:
        return x.reshape(1, 1)
    shape = x.shape
    width = 1
    split = x.ndim
    for i in range(x.ndim - 1, -1, -1):
        width *= int(shape[i])
        split = i
        if width >= LANE:
            break
    rows = 1
    for d in shape[:split]:
        rows *= int(d)
    return x.reshape(rows, width)


def _row_tiling(rows, width, dtypes, tile_bytes):
    """Row-tile size (sublane aligned) + #tiles.  Prefers a single full-extent block
    (always legal, no ragged masking) whenever the whole array fits the budget."""
    align = max(_sublane_align(d) for d in dtypes)
    per_row = width * sum(_itemsize(d) for d in dtypes)
    budget = max(1, tile_bytes // max(1, per_row))
    if rows <= max(align, budget):
        return rows, 1                       # single full-extent block
    tr = max(align, min(_round_down(budget, align), _round_down(rows, align)))
    return tr, _cdiv(rows, tr)


def _acc_rows(tr):
    """Rows of the f32 slab accumulator: largest of 64/32/16/8 dividing tr."""
    for a in (64, 32, 16, 8):
        if tr % a == 0:
            return a
    return tr


@functools.lru_cache(maxsize=1)
def _is_v7x():
    try:
        kind = jax.devices()[0].device_kind.lower()
    except Exception:
        return False
    return ("v7" in kind) or ("tpu7" in kind)


# ------------------------- in-kernel reduction helpers -------------------------

def _tree_accumulate(acc_ref, vals, tr):
    """Fold a (tr, width) f32 tile into the (A, width) accumulator using a pairwise
    tree of vreg-slab adds (pure VPU, log-depth dependency chain) + one add into acc."""
    a = acc_ref.shape[0]
    if tr == a:
        acc_ref[...] += vals
        return
    slabs = [vals[g * a:(g + 1) * a] for g in range(tr // a)]
    while len(slabs) > 1:
        nxt = [slabs[k] + slabs[k + 1] for k in range(0, len(slabs) - 1, 2)]
        if len(slabs) % 2:
            nxt.append(slabs[-1])
        slabs = nxt
    acc_ref[...] += slabs[0]


def _gated_accumulate(acc_ref, tile, tr, rows, n_tiles, make_vals):
    """Accumulate one row tile.  Ragged masking is applied ONLY on the last tile;
    overflow (clamped) grid steps are gated off by the logical tile index so there is
    no double counting.  `make_vals(mask_or_None)` builds the (tr, width) f32 tile."""
    ragged = (n_tiles * tr != rows)
    if ragged:
        @pl.when(tile < n_tiles - 1)
        def _fast():
            _tree_accumulate(acc_ref, make_vals(None), tr)

        @pl.when(tile == n_tiles - 1)
        def _edge():
            r = jax.lax.broadcasted_iota(jnp.int32, (tr, acc_ref.shape[-1]), 0)
            mask = (r + tile * tr) < rows
            _tree_accumulate(acc_ref, make_vals(mask), tr)
    else:
        @pl.when(tile < n_tiles)
        def _fast():
            _tree_accumulate(acc_ref, make_vals(None), tr)


# ------------------------- fused SSE + log-sum kernel -------------------------

def _fused_loss_kernel(*refs, n_log, kt, sse_meta, log_metas):
    x_ref, t_ref = refs[0], refs[1]
    lik_refs = refs[2:2 + n_log]
    o_sse = refs[2 + n_log]
    o_logs = refs[3 + n_log:3 + 2 * n_log]
    acc_sse = refs[3 + 2 * n_log]
    acc_logs = refs[4 + 2 * n_log:4 + 3 * n_log]

    c = pl.program_id(0)
    j = pl.program_id(1)
    tile = c * kt + j                       # logical (unclamped) row-tile index

    @pl.when(j == 0)
    def _init():
        acc_sse[...] = jnp.zeros_like(acc_sse)
        for a in acc_logs:
            a[...] = jnp.zeros_like(a)

    # --- sum((x_hat[-1] - target)**2) over this row tile ---------------------
    tr_s, rows_s, nt_s = sse_meta

    def sse_vals(mask):
        d = x_ref[0].astype(jnp.float32) - t_ref[...].astype(jnp.float32)
        sq = d * d
        if mask is not None:                # discard rows past the logical end
            sq = jnp.where(mask, sq, 0.0)
        return sq

    _gated_accumulate(acc_sse, tile, tr_s, rows_s, nt_s, sse_vals)

    # --- sum(log(x)) per likelihood tensor ------------------------------------
    for i in range(n_log):
        tr_i, rows_i, nt_i = log_metas[i]

        def log_vals(mask, i=i):
            x = lik_refs[i][...].astype(jnp.float32)
            if mask is not None:            # mask BEFORE log: log(1)=0, no NaN from pad garbage
                x = jnp.where(mask, x, 1.0)
            return jnp.log(x)

        _gated_accumulate(acc_logs[i], tile, tr_i, rows_i, nt_i, log_vals)

    @pl.when(j == kt - 1)
    def _finalize():
        o_sse[...] = jnp.full(o_sse.shape, jnp.sum(acc_sse[...]), jnp.float32)
        for i in range(n_log):
            o_logs[i][...] = jnp.full(o_logs[i].shape, jnp.sum(acc_logs[i][...]),
                                      jnp.float32)


def fused_rd_reductions(x_stack, target, log_tensors, *,
                        tile_bytes_sse=None, tile_bytes_log=None,
                        chunks=None, vmem_limit_bytes=None):
    """Returns (sum((x_stack[last]-target)**2), [sum(log(x)) for x in log_tensors])
    in a single pallas_call, with no padding / slice copies in HBM."""
    is_v7 = _is_v7x()
    if tile_bytes_sse is None:
        tile_bytes_sse = (8 << 20) if is_v7 else (4 << 20)
    if tile_bytes_log is None:
        tile_bytes_log = 2 << 20
    if chunks is None:
        chunks = 2 if is_v7 else 1          # chunk axis only buys anything on v7x
    if vmem_limit_bytes is None:
        vmem_limit_bytes = (48 << 20) if is_v7 else (64 << 20)

    # --- free 2-D views -------------------------------------------------------
    t2 = _as_2d(target)
    rows_s, width_s = int(t2.shape[0]), int(t2.shape[1])
    total = int(target.size)
    nl = int(x_stack.size) // total
    assert nl * total == int(x_stack.size), "x_hat / target element counts incompatible"
    x3 = x_stack.reshape(nl, rows_s, width_s)   # free reshape; last recon picked in-kernel
    sel = nl - 1                                # torch: x_hat[-1]

    xs2 = [_as_2d(x) for x in log_tensors]
    n_log = len(xs2)

    # --- per-tensor row tilings ----------------------------------------------
    tr_s, nt_s = _row_tiling(rows_s, width_s, [x3.dtype, t2.dtype], tile_bytes_sse)
    log_tilings = []
    for x in xs2:
        r, w = int(x.shape[0]), int(x.shape[1])
        tr, nt = _row_tiling(r, w, [x.dtype], tile_bytes_log)
        log_tilings.append((tr, r, nt, w))

    kmax = max([nt_s] + [t[2] for t in log_tilings])
    nc = max(1, min(int(chunks), kmax))
    kt = _cdiv(kmax, nc)

    def make_row_idx(n_tiles):
        return lambda c, j: jnp.minimum(c * kt + j, n_tiles - 1)

    sse_row = make_row_idx(nt_s)
    in_specs = [
        pl.BlockSpec((1, tr_s, width_s), lambda c, j: (sel, sse_row(c, j), 0)),
        pl.BlockSpec((tr_s, width_s), lambda c, j: (sse_row(c, j), 0)),
    ]
    for (tr, r, nt, w) in log_tilings:
        row = make_row_idx(nt)
        in_specs.append(pl.BlockSpec((tr, w), lambda c, j, row=row: (row(c, j), 0)))

    n_out = 1 + n_log
    out_shape = tuple(jax.ShapeDtypeStruct((nc, LANE), jnp.float32) for _ in range(n_out))
    out_specs = tuple(pl.BlockSpec((1, LANE), lambda c, j: (c, 0)) for _ in range(n_out))

    scratch = [pltpu.VMEM((_acc_rows(tr_s), width_s), jnp.float32)]
    scratch += [pltpu.VMEM((_acc_rows(tr), w), jnp.float32) for (tr, r, nt, w) in log_tilings]

    if nc > 1 and is_v7:
        # CORE_PARALLEL is the only semantics that actually shards the chunk axis
        # across v7x's two TensorCores.
        dims = (getattr(pltpu, "CORE_PARALLEL", "parallel"),
                getattr(pltpu, "ARBITRARY", "arbitrary"))
    else:
        dims = ("arbitrary", "arbitrary")

    kernel = functools.partial(
        _fused_loss_kernel, n_log=n_log, kt=kt,
        sse_meta=(tr_s, rows_s, nt_s),
        log_metas=tuple((tr, r, nt) for (tr, r, nt, w) in log_tilings))

    outs = pl.pallas_call(
        kernel,
        out_shape=out_shape,
        grid=(nc, kt),
        in_specs=in_specs,
        out_specs=out_specs,
        scratch_shapes=scratch,
        compiler_params=pltpu.CompilerParams(
            dimension_semantics=dims, vmem_limit_bytes=vmem_limit_bytes),
    )(x3, t2, *xs2)

    sse = jnp.sum(outs[0][:, 0])
    log_sums = [jnp.sum(o[:, 0]) for o in outs[1:]]
    return sse, log_sums


# ------------------------- module forward -------------------------

def mask_rate_distortion_loss(output, target, lmbda=0.01, weight=255.0 ** 2):
    """JAX/Pallas port of MaskRateDistortionLoss.forward."""
    B, _, H, W = target.shape
    num_pixels = B * H * W
    denominator = -math.log(2) * num_pixels

    x_hat = output['x_hat']
    if isinstance(x_hat, (list, tuple)):
        x_stack = x_hat[-1]                  # Python list indexing: no copy
    else:
        x_stack = x_hat                      # stacked reconstructions; last selected in-kernel

    likelihoods = output['likelihoods']
    has_prog = 'y_prog' in likelihoods
    log_inputs = [likelihoods['z'], likelihoods['y']]
    if has_prog:
        log_inputs.append(likelihoods['y_prog'])

    sse, log_sums = fused_rd_reductions(x_stack, target, log_inputs)

    out = {}
    # nn.MSELoss() (mean over all elements); .squeeze(0) never changes the pairing/sum.
    out['mse_loss'] = sse / jnp.float32(target.size)
    # The torch branch `if 'z_prog' in list(out.keys())` is dead code (out only has
    # 'mse_loss' at that point), so it is intentionally omitted here.
    out['bpp_hype'] = log_sums[0] / denominator
    out['bpp_base'] = log_sums[1] / denominator
    if has_prog:
        out['bpp_scalable'] = log_sums[2] / denominator
    else:
        out['bpp_scalable'] = log_sums[1] * 0.0      # torch multiplies the sum by 0.0
    out['bpp_loss'] = out['bpp_scalable'] + out['bpp_hype']
    out['loss'] = out['bpp_loss'] + weight * jnp.mean(lmbda * out['mse_loss'])
    return out


# ------------------------- demo / self-check -------------------------

if __name__ == "__main__":
    keys = jax.random.split(jax.random.PRNGKey(0), 9)

    # Small shapes consistent with the module (N quality levels, NCHW images, latents).
    N, B, C, H, W = 2, 2, 3, 16, 16
    target = jax.random.uniform(keys[0], (B, C, H, W), jnp.float32)
    x_hat = jax.random.uniform(keys[1], (N, B, C, H, W), jnp.float32)
    lik_y = jax.random.uniform(keys[2], (B, 32, H // 4, W // 4), jnp.float32,
                               minval=0.05, maxval=1.0)
    lik_z = jax.random.uniform(keys[3], (B, 16, H // 8, W // 8), jnp.float32,
                               minval=0.05, maxval=1.0)
    lik_yp = jax.random.uniform(keys[4], (N, B, 32, H // 4, W // 4), jnp.float32,
                                minval=0.05, maxval=1.0)

    output = {'x_hat': x_hat,
              'likelihoods': {'y': lik_y, 'z': lik_z, 'y_prog': lik_yp}}

    res = jax.jit(mask_rate_distortion_loss)(output, target)
    jax.block_until_ready(res['loss'])

    # Pure-JAX reference of the torch forward.
    denom = -math.log(2) * (B * H * W)
    mse_ref = jnp.mean((x_hat[-1] - target) ** 2)
    bpp_hype_ref = jnp.sum(jnp.log(lik_z)) / denom
    bpp_base_ref = jnp.sum(jnp.log(lik_y)) / denom
    bpp_scal_ref = jnp.sum(jnp.log(lik_yp)) / denom
    loss_ref = (bpp_scal_ref + bpp_hype_ref) + (255.0 ** 2) * (0.01 * mse_ref)

    assert jnp.allclose(res['mse_loss'], mse_ref, rtol=1e-4, atol=1e-5)
    assert jnp.allclose(res['bpp_hype'], bpp_hype_ref, rtol=1e-4, atol=1e-5)
    assert jnp.allclose(res['bpp_base'], bpp_base_ref, rtol=1e-4, atol=1e-5)
    assert jnp.allclose(res['bpp_scalable'], bpp_scal_ref, rtol=1e-4, atol=1e-5)
    assert jnp.allclose(res['bpp_loss'], bpp_scal_ref + bpp_hype_ref, rtol=1e-4, atol=1e-5)
    assert jnp.allclose(res['loss'], loss_ref, rtol=1e-4, atol=1e-3)

    # Path without progressive likelihoods (bpp_scalable forced to 0).
    res2 = jax.jit(mask_rate_distortion_loss)(
        {'x_hat': x_hat, 'likelihoods': {'y': lik_y, 'z': lik_z}}, target)
    jax.block_until_ready(res2['loss'])
    assert jnp.allclose(res2['bpp_scalable'], 0.0, atol=1e-7)
    assert jnp.allclose(res2['bpp_loss'], bpp_hype_ref, rtol=1e-4, atol=1e-5)

    # Exercise the multi-tile / chunked / clamped / masked-last-tile code paths with
    # deliberately tiny tile budgets (84 rows is not a multiple of the 8-row tile).
    xa = jax.random.uniform(keys[5], (3, 84, 144), jnp.float32)
    tb = jax.random.uniform(keys[6], (84, 144), jnp.float32)
    pa = jax.random.uniform(keys[7], (84, 144), jnp.float32, minval=0.05, maxval=1.0)
    pb = jax.random.uniform(keys[8], (40, 144), jnp.float32, minval=0.05, maxval=1.0)
    sse_s, logs_s = fused_rd_reductions(
        xa, tb, [pa, pb],
        tile_bytes_sse=16 * 144 * 8,      # 16-row SSE tiles  -> 6 tiles, ragged last
        tile_bytes_log=8 * 144 * 4,       # 8-row log tiles   -> 11 / 5 tiles
        chunks=2)                         # forces the chunked + clamped path
    jax.block_until_ready(sse_s)
    assert jnp.allclose(sse_s, jnp.sum((xa[-1] - tb) ** 2), rtol=1e-4, atol=1e-2)
    assert jnp.allclose(logs_s[0], jnp.sum(jnp.log(pa)), rtol=1e-4, atol=1e-2)
    assert jnp.allclose(logs_s[1], jnp.sum(jnp.log(pb)), rtol=1e-4, atol=1e-2)

    print("KERNEL_OK")
</pallas_src>

<mosaic_0001>
module attributes {stable_mosaic.version = 11 : i64} {
  func.func @_fused_loss_kernel(%arg0: i32, %arg1: i32, %arg2: memref<1x6x256xf32, #tpu.memory_space<vmem>>, %arg3: memref<6x256xf32, #tpu.memory_space<vmem>>, %arg4: memref<1x128xf32, #tpu.memory_space<vmem>>, %arg5: memref<2x512xf32, #tpu.memory_space<vmem>>, %arg6: memref<4x512xf32, #tpu.memory_space<vmem>>, %arg7: memref<1x128xf32, #tpu.memory_space<vmem>>, %arg8: memref<1x128xf32, #tpu.memory_space<vmem>>, %arg9: memref<1x128xf32, #tpu.memory_space<vmem>>, %arg10: memref<1x128xf32, #tpu.memory_space<vmem>>, %arg11: memref<6x256xf32, #tpu.memory_space<vmem>>, %arg12: memref<1x128xf32, #tpu.memory_space<vmem>>, %arg13: memref<2x512xf32, #tpu.memory_space<vmem>>, %arg14: memref<4x512xf32, #tpu.memory_space<vmem>>) attributes {dimension_semantics = [#tpu.dimension_semantics<arbitrary>, #tpu.dimension_semantics<arbitrary>], iteration_bounds = array<i64: 1, 1>, scalar_prefetch = 0 : i64, scratch_operands = 4 : i64, tpu.core_type = #tpu.core_type<tc>, window_params = [{transform_indices = @transform_0, window_bounds = array<i64: 1, 6, 256>}, {transform_indices = @transform_1, window_bounds = array<i64: 6, 256>}, {transform_indices = @transform_2, window_bounds = array<i64: 1, 128>}, {transform_indices = @transform_3, window_bounds = array<i64: 2, 512>}, {transform_indices = @transform_4, window_bounds = array<i64: 4, 512>}, {transform_indices = @transform_5, window_bounds = array<i64: 1, 128>}, {transform_indices = @transform_6, window_bounds = array<i64: 1, 128>}, {transform_indices = @transform_7, window_bounds = array<i64: 1, 128>}, {transform_indices = @transform_8, window_bounds = array<i64: 1, 128>}]} {
    %c1_i32 = arith.constant 1 : i32
    %0 = arith.muli %arg0, %c1_i32 : i32
    %1 = arith.addi %0, %arg1 : i32
    %c0_i32 = arith.constant 0 : i32
    %2 = arith.cmpi eq, %arg1, %c0_i32 : i32
    %3 = arith.extui %2 : i1 to i32
    %c0_i32_0 = arith.constant 0 : i32
    %4 = arith.cmpi ne, %3, %c0_i32_0 : i32
    scf.if %4 {
      %cst = arith.constant 0.000000e+00 : f32
      %20 = vector.broadcast %cst : f32 to vector<6x256xf32>
      %c0 = arith.constant 0 : index
      %c0_11 = arith.constant 0 : index
      %21 = vector.load %arg11[%c0, %c0_11] : memref<6x256xf32, #tpu.memory_space<vmem>>, vector<6x256xf32>
      tpu.vector_store %arg11[%c0, %c0_11], %20 {strides = array<i32>} : memref<6x256xf32, #tpu.memory_space<vmem>>, vector<6x256xf32>,
      %cst_12 = arith.constant 0.000000e+00 : f32
      %22 = vector.broadcast %cst_12 : f32 to vector<1x128xf32>
      %c0_13 = arith.constant 0 : index
      %c0_14 = arith.constant 0 : index
      %23 = vector.load %arg12[%c0_13, %c0_14] : memref<1x128xf32, #tpu.memory_space<vmem>>, vector<1x128xf32>
      tpu.vector_store %arg12[%c0_13, %c0_14], %22 {strides = array<i32>} : memref<1x128xf32, #tpu.memory_space<vmem>>, vector<1x128xf32>,
      %cst_15 = arith.constant 0.000000e+00 : f32
      %24 = vector.broadcast %cst_15 : f32 to vector<2x512xf32>
      %c0_16 = arith.constant 0 : index
      %c0_17 = arith.constant 0 : index
      %25 = vector.load %arg13[%c0_16, %c0_17] : memref<2x512xf32, #tpu.memory_space<vmem>>, vector<2x512xf32>
      tpu.vector_store %arg13[%c0_16, %c0_17], %24 {strides = array<i32>} : memref<2x512xf32, #tpu.memory_space<vmem>>, vector<2x512xf32>,
      %cst_18 = arith.constant 0.000000e+00 : f32
      %26 = vector.broadcast %cst_18 : f32 to vector<4x512xf32>
      %c0_19 = arith.constant 0 : index
      %c0_20 = arith.constant 0 : index
      %27 = vector.load %arg14[%c0_19, %c0_20] : memref<4x512xf32, #tpu.memory_space<vmem>>, vector<4x512xf32>
      tpu.vector_store %arg14[%c0_19, %c0_20], %26 {strides = array<i32>} : memref<4x512xf32, #tpu.memory_space<vmem>>, vector<4x512xf32>,
    } else {
    }
    %c1_i32_1 = arith.constant 1 : i32
    %5 = arith.cmpi slt, %1, %c1_i32_1 : i32
    %6 = arith.extui %5 : i1 to i32
    %c0_i32_2 = arith.constant 0 : i32
    %7 = arith.cmpi ne, %6, %c0_i32_2 : i32
    scf.if %7 {
      %c0 = arith.constant 0 : index
      %c0_11 = arith.constant 0 : index
      %c0_12 = arith.constant 0 : index
      %20 = vector.load %arg2[%c0, %c0_11, %c0_12] : memref<1x6x256xf32, #tpu.memory_space<vmem>>, vector<1x6x256xf32>
      %21 = vector.shape_cast %20 : vector<1x6x256xf32> to vector<6x256xf32>
      %c0_13 = arith.constant 0 : index
      %c0_14 = arith.constant 0 : index
      %22 = vector.load %arg3[%c0_13, %c0_14] : memref<6x256xf32, #tpu.memory_space<vmem>>, vector<6x256xf32>
      %23 = arith.subf %21, %22 : vector<6x256xf32>
      %24 = arith.mulf %23, %23 : vector<6x256xf32>
      %c0_15 = arith.constant 0 : index
      %c0_16 = arith.constant 0 : index
      %25 = vector.load %arg11[%c0_15, %c0_16] : memref<6x256xf32, #tpu.memory_space<vmem>>, vector<6x256xf32>
      %26 = arith.addf %25, %24 : vector<6x256xf32>
      %c0_17 = arith.constant 0 : index
      %c0_18 = arith.constant 0 : index
      %27 = vector.load %arg11[%c0_17, %c0_18] : memref<6x256xf32, #tpu.memory_space<vmem>>, vector<6x256xf32>
      tpu.vector_store %arg11[%c0_17, %c0_18], %26 {strides = array<i32>} : memref<6x256xf32, #tpu.memory_space<vmem>>, vector<6x256xf32>,
    } else {
    }
    %c1_i32_3 = arith.constant 1 : i32
    %8 = arith.cmpi slt, %1, %c1_i32_3 : i32
    %9 = arith.extui %8 : i1 to i32
    %c0_i32_4 = arith.constant 0 : i32
    %10 = arith.cmpi ne, %9, %c0_i32_4 : i32
    scf.if %10 {
      %c0 = arith.constant 0 : index
      %c0_11 = arith.constant 0 : index
      %20 = vector.load %arg4[%c0, %c0_11] : memref<1x128xf32, #tpu.memory_space<vmem>>, vector<1x128xf32>
      %21 = math.log %20 : vector<1x128xf32>
      %c0_12 = arith.constant 0 : index
      %c0_13 = arith.constant 0 : index
      %22 = vector.load %arg12[%c0_12, %c0_13] : memref<1x128xf32, #tpu.memory_space<vmem>>, vector<1x128xf32>
      %23 = arith.addf %22, %21 : vector<1x128xf32>
      %c0_14 = arith.constant 0 : index
      %c0_15 = arith.constant 0 : index
      %24 = vector.load %arg12[%c0_14, %c0_15] : memref<1x128xf32, #tpu.memory_space<vmem>>, vector<1x128xf32>
      tpu.vector_store %arg12[%c0_14, %c0_15], %23 {strides = array<i32>} : memref<1x128xf32, #tpu.memory_space<vmem>>, vector<1x128xf32>,
    } else {
    }
    %c1_i32_5 = arith.constant 1 : i32
    %11 = arith.cmpi slt, %1, %c1_i32_5 : i32
    %12 = arith.extui %11 : i1 to i32
    %c0_i32_6 = arith.constant 0 : i32
    %13 = arith.cmpi ne, %12, %c0_i32_6 : i32
    scf.if %13 {
      %c0 = arith.constant 0 : index
      %c0_11 = arith.constant 0 : index
      %20 = vector.load %arg5[%c0, %c0_11] : memref<2x512xf32, #tpu.memory_space<vmem>>, vector<2x512xf32>
      %21 = math.log %20 : vector<2x512xf32>
      %c0_12 = arith.constant 0 : index
      %c0_13 = arith.constant 0 : index
      %22 = vector.load %arg13[%c0_12, %c0_13] : memref<2x512xf32, #tpu.memory_space<vmem>>, vector<2x512xf32>
      %23 = arith.addf %22, %21 : vector<2x512xf32>
      %c0_14 = arith.constant 0 : index
      %c0_15 = arith.constant 0 : index
      %24 = vector.load %arg13[%c0_14, %c0_15] : memref<2x512xf32, #tpu.memory_space<vmem>>, vector<2x512xf32>
      tpu.vector_store %arg13[%c0_14, %c0_15], %23 {strides = array<i32>} : memref<2x512xf32, #tpu.memory_space<vmem>>, vector<2x512xf32>,
    } else {
    }
    %c1_i32_7 = arith.constant 1 : i32
    %14 = arith.cmpi slt, %1, %c1_i32_7 : i32
    %15 = arith.extui %14 : i1 to i32
    %c0_i32_8 = arith.constant 0 : i32
    %16 = arith.cmpi ne, %15, %c0_i32_8 : i32
    scf.if %16 {
      %c0 = arith.constant 0 : index
      %c0_11 = arith.constant 0 : index
      %20 = vector.load %arg6[%c0, %c0_11] : memref<4x512xf32, #tpu.memory_space<vmem>>, vector<4x512xf32>
      %21 = math.log %20 : vector<4x512xf32>
      %c0_12 = arith.constant 0 : index
      %c0_13 = arith.constant 0 : index
      %22 = vector.load %arg14[%c0_12, %c0_13] : memref<4x512xf32, #tpu.memory_space<vmem>>, vector<4x512xf32>
      %23 = arith.addf %22, %21 : vector<4x512xf32>
      %c0_14 = arith.constant 0 : index
      %c0_15 = arith.constant 0 : index
      %24 = vector.load %arg14[%c0_14, %c0_15] : memref<4x512xf32, #tpu.memory_space<vmem>>, vector<4x512xf32>
      tpu.vector_store %arg14[%c0_14, %c0_15], %23 {strides = array<i32>} : memref<4x512xf32, #tpu.memory_space<vmem>>, vector<4x512xf32>,
    } else {
    }
    %c0_i32_9 = arith.constant 0 : i32
    %17 = arith.cmpi eq, %arg1, %c0_i32_9 : i32
    %18 = arith.extui %17 : i1 to i32
    %c0_i32_10 = arith.constant 0 : i32
    %19 = arith.cmpi ne, %18, %c0_i32_10 : i32
    scf.if %19 {
      %c0 = arith.constant 0 : index
      %c0_11 = arith.constant 0 : index
      %20 = vector.load %arg11[%c0, %c0_11] : memref<6x256xf32, #tpu.memory_space<vmem>>, vector<6x256xf32>
      %21 = vector.shape_cast %20 : vector<6x256xf32> to vector<1x6x256xf32>
      %cst = arith.constant dense<0.000000e+00> : vector<1xf32>
      %22 = vector.multi_reduction <add>, %21, %cst [1, 2] : vector<1x6x256xf32> to vector<1xf32>
      %23 = vector.shape_cast %22 : vector<1xf32> to vector<1x1x1xf32>
      %24 = vector.extract %23[0, 0, 0] : f32 from vector<1x1x1xf32>
      %25 = vector.broadcast %24 : f32 to vector<1x128xf32>
      %c0_12 = arith.constant 0 : index
      %c0_13 = arith.constant 0 : index
      %26 = vector.load %arg7[%c0_12, %c0_13] : memref<1x128xf32, #tpu.memory_space<vmem>>, vector<1x128xf32>
      tpu.vector_store %arg7[%c0_12, %c0_13], %25 {strides = array<i32>} : memref<1x128xf32, #tpu.memory_space<vmem>>, vector<1x128xf32>,
      %c0_14 = arith.constant 0 : index
      %c0_15 = arith.constant 0 : index
      %27 = vector.load %arg12[%c0_14, %c0_15] : memref<1x128xf32, #tpu.memory_space<vmem>>, vector<1x128xf32>
      %28 = vector.shape_cast %27 : vector<1x128xf32> to vector<1x1x128xf32>
      %cst_16 = arith.constant dense<0.000000e+00> : vector<1xf32>
      %29 = vector.multi_reduction <add>, %28, %cst_16 [1, 2] : vector<1x1x128xf32> to vector<1xf32>
      %30 = vector.shape_cast %29 : vector<1xf32> to vector<1x1x1xf32>
      %31 = vector.extract %30[0, 0, 0] : f32 from vector<1x1x1xf32>
      %32 = vector.broadcast %31 : f32 to vector<1x128xf32>
      %c0_17 = arith.constant 0 : index
      %c0_18 = arith.constant 0 : index
      %33 = vector.load %arg8[%c0_17, %c0_18] : memref<1x128xf32, #tpu.memory_space<vmem>>, vector<1x128xf32>
      tpu.vector_store %arg8[%c0_17, %c0_18], %32 {strides = array<i32>} : memref<1x128xf32, #tpu.memory_space<vmem>>, vector<1x128xf32>,
      %c0_19 = arith.constant 0 : index
      %c0_20 = arith.constant 0 : index
      %34 = vector.load %arg13[%c0_19, %c0_20] : memref<2x512xf32, #tpu.memory_space<vmem>>, vector<2x512xf32>
      %35 = vector.shape_cast %34 : vector<2x512xf32> to vector<1x2x512xf32>
      %cst_21 = arith.constant dense<0.000000e+00> : vector<1xf32>
      %36 = vector.multi_reduction <add>, %35, %cst_21 [1, 2] : vector<1x2x512xf32> to vector<1xf32>
      %37 = vector.shape_cast %36 : vector<1xf32> to vector<1x1x1xf32>
      %38 = vector.extract %37[0, 0, 0] : f32 from vector<1x1x1xf32>
      %39 = vector.broadcast %38 : f32 to vector<1x128xf32>
      %c0_22 = arith.constant 0 : index
      %c0_23 = arith.constant 0 : index
      %40 = vector.load %arg9[%c0_22, %c0_23] : memref<1x128xf32, #tpu.memory_space<vmem>>, vector<1x128xf32>
      tpu.vector_store %arg9[%c0_22, %c0_23], %39 {strides = array<i32>} : memref<1x128xf32, #tpu.memory_space<vmem>>, vector<1x128xf32>,
      %c0_24 = arith.constant 0 : index
      %c0_25 = arith.constant 0 : index
      %41 = vector.load %arg14[%c0_24, %c0_25] : memref<4x512xf32, #tpu.memory_space<vmem>>, vector<4x512xf32>
      %42 = vector.shape_cast %41 : vector<4x512xf32> to vector<1x4x512xf32>
      %cst_26 = arith.constant dense<0.000000e+00> : vector<1xf32>
      %43 = vector.multi_reduction <add>, %42, %cst_26 [1, 2] : vector<1x4x512xf32> to vector<1xf32>
      %44 = vector.shape_cast %43 : vector<1xf32> to vector<1x1x1xf32>
      %45 = vector.extract %44[0, 0, 0] : f32 from vector<1x1x1xf32>
      %46 = vector.broadcast %45 : f32 to vector<1x128xf32>
      %c0_27 = arith.constant 0 : index
      %c0_28 = arith.constant 0 : index
      %47 = vector.load %arg10[%c0_27, %c0_28] : memref<1x128xf32, #tpu.memory_space<vmem>>, vector<1x128xf32>
      tpu.vector_store %arg10[%c0_27, %c0_28], %46 {strides = array<i32>} : memref<1x128xf32, #tpu.memory_space<vmem>>, vector<1x128xf32>,
    } else {
    }
    return
  }
  func.func @transform_0(%arg0: i32, %arg1: i32) -> (i32, i32, i32) {
    %c1_i32 = arith.constant 1 : i32
    %0 = arith.muli %arg0, %c1_i32 : i32
    %1 = arith.addi %0, %arg1 : i32
    %c0_i32 = arith.constant 0 : i32
    %2 = arith.minsi %1, %c0_i32 : i32
    %c1_i32_0 = arith.constant 1 : i32
    %c0_i32_1 = arith.constant 0 : i32
    %c0_i32_2 = arith.constant 0 : i32
    return %c1_i32_0, %2, %c0_i32_1 : i32, i32, i32
  }
  func.func @transform_1(%arg0: i32, %arg1: i32) -> (i32, i32) {
    %c1_i32 = arith.constant 1 : i32
    %0 = arith.muli %arg0, %c1_i32 : i32
    %1 = arith.addi %0, %arg1 : i32
    %c0_i32 = arith.constant 0 : i32
    %2 = arith.minsi %1, %c0_i32 : i32
    %c0_i32_0 = arith.constant 0 : i32
    %c0_i32_1 = arith.constant 0 : i32
    return %2, %c0_i32_0 : i32, i32
  }
  func.func @transform_2(%arg0: i32, %arg1: i32) -> (i32, i32) {
    %c1_i32 = arith.constant 1 : i32
    %0 = arith.muli %arg0, %c1_i32 : i32
    %1 = arith.addi %0, %arg1 : i32
    %c0_i32 = arith.constant 0 : i32
    %2 = arith.minsi %1, %c0_i32 : i32
    %c0_i32_0 = arith.constant 0 : i32
    %c0_i32_1 = arith.constant 0 : i32
    return %2, %c0_i32_0 : i32, i32
  }
  func.func @transform_3(%arg0: i32, %arg1: i32) -> (i32, i32) {
    %c1_i32 = arith.constant 1 : i32
    %0 = arith.muli %arg0, %c1_i32 : i32
    %1 = arith.addi %0, %arg1 : i32
    %c0_i32 = arith.constant 0 : i32
    %2 = arith.minsi %1, %c0_i32 : i32
    %c0_i32_0 = arith.constant 0 : i32
    %c0_i32_1 = arith.constant 0 : i32
    return %2, %c0_i32_0 : i32, i32
  }
  func.func @transform_4(%arg0: i32, %arg1: i32) -> (i32, i32) {
    %c1_i32 = arith.constant 1 : i32
    %0 = arith.muli %arg0, %c1_i32 : i32
    %1 = arith.addi %0, %arg1 : i32
    %c0_i32 = arith.constant 0 : i32
    %2 = arith.minsi %1, %c0_i32 : i32
    %c0_i32_0 = arith.constant 0 : i32
    %c0_i32_1 = arith.constant 0 : i32
    return %2, %c0_i32_0 : i32, i32
  }
  func.func @transform_5(%arg0: i32, %arg1: i32) -> (i32, i32) {
    %c0_i32 = arith.constant 0 : i32
    %c0_i32_0 = arith.constant 0 : i32
    return %arg0, %c0_i32 : i32, i32
  }
  func.func @transform_6(%arg0: i32, %arg1: i32) -> (i32, i32) {
    %c0_i32 = arith.constant 0 : i32
    %c0_i32_0 = arith.constant 0 : i32
    return %arg0, %c0_i32 : i32, i32
  }
  func.func @transform_7(%arg0: i32, %arg1: i32) -> (i32, i32) {
    %c0_i32 = arith.constant 0 : i32
    %c0_i32_0 = arith.constant 0 : i32
    return %arg0, %c0_i32 : i32, i32
  }
  func.func @transform_8(%arg0: i32, %arg1: i32) -> (i32, i32) {
    %c0_i32 = arith.constant 0 : i32
    %c0_i32_0 = arith.constant 0 : i32
    return %arg0, %c0_i32 : i32, i32
  }
}

</mosaic_0001>

<bundles_post_ra>
// kernel: mask_rate_distortion_loss.1
= control target key start
LH: loop header
LB: loop body
LE: loop exit
PB: predicated region body
PF: predicated region fallthrough
CT: control target
= control target key end

     0   :  { %14 = vsyncpa [#allocation7], 0  ;;  %s781_s0 = inlined_call_operand.hbm [shape: f32[2,6,256], index: 0, kind: input, shape index: {}]   ;;  %s782_s1 = inlined_call_operand.hbm [shape: f32[6,256], index: 1, kind: input, shape index: {}]   ;;  %s783_s2 = inlined_call_operand.hbm [shape: f32[1,128], index: 2, kind: input, shape index: {}]   ;;  %s784_s3 = inlined_call_operand.hbm [shape: f32[2,512], index: 3, kind: input, shape index: {}]   ;;  %s785_s4 = inlined_call_operand.hbm [shape: f32[4,512], index: 4, kind: input, shape index: {}]   ;;  %s786_s5 = inlined_call_operand.hbm [shape: f32[1,128], index: 5, kind: output, shape index: {0}]   ;;  %s787_s6 = inlined_call_operand.hbm [shape: f32[1,128], index: 6, kind: output, shape index: {1}]   ;;  %s788_s7 = inlined_call_operand.hbm [shape: f32[1,128], index: 7, kind: output, shape index: {2}]   ;;  %s789_s8 = inlined_call_operand.hbm [shape: f32[1,128], index: 8, kind: output, shape index: {3}]  }
   0x1   :  { %15 = vsyncpa [#allocation10], 0 }
   0x2   :  { %16 = vsyncpa [#allocation13], 0 }
   0x3   :  { %17 = vsyncpa [#allocation8], 0 }
   0x4   :  { %18 = vsyncpa [#allocation17], 0 }
   0x5   :  { %19 = vsyncpa [#allocation20], 0  ;;  %s596_s27 = smov [#allocation9]   ;;  %s597_s29 = smov [#allocation12]  }
   0x6   :  { %s49_s28 = sshll.u32 %s596_s27, 4  ;;  %s80_s30 = sshll.u32 %s597_s29, 4  ;;  %s50_s28 = int_to_ptr.vmem [resolvable:$true] %s49_s28  ;;  %s81_s30 = int_to_ptr.vmem [resolvable:$true] %s80_s30 }
   0x7   :  { %s383_s11 = scalar_lea.hbm %s782_s1, 256 }
   0x8   :  { %p384_p0 = scmp.ne.s32.totalorder %s782_s1, %s383_s11  ;;  %p387_p1 = scmp.lt.u32.totalorder %s383_s11, %s782_s1 }
   0xa   :  { %p389_p2 = pnand %p387_p1, %p384_p0 }
   0xc   :  { %392 = shalt.err (!%p389_p2)
}
   0xd   :  { %s393_s16 = scalar_lea.vmem %s50_s28, 256  ;;  %p398_p4 = scmp.lt.s32.totalorder %s50_s28, %s50_s28 }
   0xe   :  { %p394_p3 = scmp.ne.s32.totalorder %s50_s28, %s393_s16  ;;  %p399_p5 = scmp.lt.s32.totalorder %s393_s16, %s393_s16 }
  0x10   :  { %p400_p6 = por %p399_p5, %p398_p4 }
  0x12   :  { %p401_p7 = pnand %p400_p6, %p394_p3 }
  0x14   :  { %404 = shalt.err (!%p401_p7)
}
  0x15   :  { %52 = dma.hbm_to_vmem [thread:$0]  %s782_s1, 256, %s50_s28, [#allocation10]  }
  0x16   :  { %s405_s21 = scalar_lea.hbm %s784_s3, 128 }
  0x17   :  { %p406_p8 = scmp.ne.s32.totalorder %s784_s3, %s405_s21  ;;  %p409_p9 = scmp.lt.u32.totalorder %s405_s21, %s784_s3 }
  0x19   :  { %p411_p10 = pnand %p409_p9, %p406_p8 }
  0x1b   :  { %414 = shalt.err (!%p411_p10)
}
  0x1c   :  { %s415_s26 = scalar_lea.vmem %s81_s30, 128  ;;  %p420_p12 = scmp.lt.s32.totalorder %s81_s30, %s81_s30 }
  0x1d   :  { %p416_p11 = scmp.ne.s32.totalorder %s81_s30, %s415_s26  ;;  %p421_p13 = scmp.lt.s32.totalorder %s415_s26, %s415_s26 }
  0x1f   :  { %p422_p0 = por %p421_p13, %p420_p12 }
  0x21   :  { %p423_p1 = pnand %p422_p0, %p416_p11 }
  0x23   :  { %426 = shalt.err (!%p423_p1)
}
  0x24   :  { %83 = dma.hbm_to_vmem [thread:$0]  %s784_s3, 128, %s81_s30, [#allocation13]  }
  0x25   :  { %s347_s9 = scalar_lea.hbm %s781_s0, 256  ;;  %s598_s10 = smov [#allocation6]  }
  0x26   :  { %s33_s11 = sshll.u32 %s598_s10, 4  ;;  %s599_s12 = smov [#allocation11]   ;;  %s34_s11 = int_to_ptr.vmem [resolvable:$true] %s33_s11 }
  0x27   :  { %s64_s13 = sshll.u32 %s599_s12, 4  ;;  %s451_s16 = scalar_lea.hbm %s781_s0, 512  ;;  %s65_s13 = int_to_ptr.vmem [resolvable:$true] %s64_s13 }
  0x28   :  { %p428_p2 = scmp.ne.s32.totalorder %s347_s9, %s451_s16  ;;  %p430_p3 = scmp.lt.u32.totalorder %s347_s9, %s781_s0 }
  0x29   :  { %p431_p4 = scmp.lt.u32.totalorder %s451_s16, %s451_s16  ;;  %p433_p6 = scmp.lt.u32.totalorder %s451_s16, %s347_s9 }
  0x2b   :  { %p432_p5 = por %p431_p4, %p430_p3 }
  0x2d   :  { %p434_p7 = por %p433_p6, %p432_p5 }
  0x2f   :  { %p435_p8 = pnand %p434_p7, %p428_p2 }
  0x31   :  { %438 = shalt.err (!%p435_p8)
}
  0x32   :  { %s439_s3 = scalar_lea.vmem %s34_s11, 256  ;;  %p444_p10 = scmp.lt.s32.totalorder %s34_s11, %s34_s11 }
  0x33   :  { %p440_p9 = scmp.ne.s32.totalorder %s34_s11, %s439_s3  ;;  %p445_p11 = scmp.lt.s32.totalorder %s439_s3, %s439_s3 }
  0x35   :  { %p446_p12 = por %p445_p11, %p444_p10 }
  0x37   :  { %p447_p13 = pnand %p446_p12, %p440_p9 }
  0x39   :  { %450 = shalt.err (!%p447_p13)
}
  0x3a   :  { %36 = dma.hbm_to_vmem [thread:$0]  %s347_s9, 256, %s34_s11, [#allocation7]  }
  0x3b   :  { %s452_s20 = scalar_lea.hbm %s783_s2, 16 }
  0x3c   :  { %p453_p0 = scmp.ne.s32.totalorder %s783_s2, %s452_s20  ;;  %p456_p1 = scmp.lt.u32.totalorder %s452_s20, %s783_s2 }
  0x3e   :  { %p458_p2 = pnand %p456_p1, %p453_p0 }
  0x40   :  { %461 = shalt.err (!%p458_p2)
}
  0x41   :  { %s462_s24 = scalar_lea.vmem %s65_s13, 16  ;;  %s466_s25 = scalar_lea.vmem %s65_s13, 32 }
  0x42   :  { %p463_p3 = scmp.ne.s32.totalorder %s65_s13, %s462_s24  ;;  %p467_p4 = scmp.lt.s32.totalorder %s65_s13, %s65_s13 }
  0x43   :  { %p468_p5 = scmp.lt.s32.totalorder %s466_s25, %s462_s24 }
  0x45   :  { %p469_p6 = por %p468_p5, %p467_p4 }
  0x47   :  { %p470_p7 = pnand %p469_p6, %p463_p3 }
  0x49   :  { %473 = shalt.err (!%p470_p7)
}
  0x4a   :  { %67 = dma.hbm_to_vmem [thread:$0]  %s783_s2, 16, %s65_s13, [#allocation10]  }
  0x4b   :  { %s600_s27 = smov [#allocation14]   ;;  %s474_s10 = scalar_lea.hbm %s785_s4, 256 }
  0x4c   :  { %s96_s28 = sshll.u32 %s600_s27, 4  ;;  %p475_p8 = scmp.ne.s32.totalorder %s785_s4, %s474_s10  ;;  %s97_s28 = int_to_ptr.vmem [resolvable:$true] %s96_s28 }
  0x4d   :  { %p478_p9 = scmp.lt.u32.totalorder %s474_s10, %s785_s4 }
  0x4f   :  { %p480_p10 = pnand %p478_p9, %p475_p8 }
  0x51   :  { %483 = shalt.err (!%p480_p10)
}
  0x52   :  { %s484_s16 = scalar_lea.vmem %s97_s28, 256  ;;  %p489_p12 = scmp.lt.s32.totalorder %s97_s28, %s97_s28 }
  0x53   :  { %p485_p11 = scmp.ne.s32.totalorder %s97_s28, %s484_s16  ;;  %p490_p13 = scmp.lt.s32.totalorder %s484_s16, %s484_s16 }
  0x55   :  { %p491_p0 = por %p490_p13, %p489_p12 }
  0x57   :  { %p492_p1 = pnand %p491_p0, %p485_p11 }
  0x59   :  { %495 = shalt.err (!%p492_p1)
}
  0x5a   :  { %99 = dma.hbm_to_vmem [thread:$0]  %s785_s4, 256, %s97_s28, [#allocation13]  }
  0x5b   :  { %584 = dma.done.wait [#allocation7], 256  }
  0x5c   :  { %585 = vsyncadd [#allocation7], 4294967040 }
  0x5d   :  { %586 = dma.done.wait [#allocation10], 272  }
  0x5e   :  { %587 = vsyncadd [#allocation10], 4294967024 }
  0x5f   :  { %588 = dma.done.wait [#allocation13], 384  }
  0x60   :  { %589 = vsyncadd [#allocation13], 4294966912  ;;  %v601_v0 = vmov 0.0   ;;  %v145_v1 = vld [vmem:[#allocation6] sm:$0x3f]  ;;  %v171_v12 = vld [vmem:[#allocation14] sm:$0xff]  ;;  %v223_v17 = vlaneseq }
  0x61   :  { %135 = vst [vmem:[#allocation2] sm:$0x3f] %v601_v0  ;;  %136 = vst [vmem:[#allocation2 + $0x8] sm:$0x3f] %v601_v0  ;;  %v146_v2 = vld [vmem:[#allocation6 + $0x8] sm:$0x3f] }
  0x62   :  { %137 = vst [vmem:[#allocation3] sm:$0x1] %v601_v0  ;;  %v147_v3 = vld [vmem:[#allocation9] sm:$0x3f]  ;;  %v148_v4 = vld [vmem:[#allocation9 + $0x8] sm:$0x3f] }
  0x63   :  { %v149_v5 = vsub.f32 %v145_v1, %v147_v3  ;;  %v150_v6 = vsub.f32 %v146_v2, %v148_v4  ;;  %v165_v8 = vld [vmem:[#allocation12] sm:$0xff]  ;;  %v159_v9 = vld [vmem:[#allocation11] sm:$0x1]  ;;  %v172_v13 = vld [vmem:[#allocation14 + $0x8] sm:$0xff]  ;;  %v602_v15 = vmov 1983009808  }
  0x64   :  { %375 = vlog2.f32 %v165_v8  ;;  %v221_v16 = vunpack.c.l.s4 %v602_v15  ;;  %v224_v21 = vshrl.u32 %v223_v17, 7  ;;  %vm188_vm0 = vcmask 1045504   ;;  %s603_s4 = smov [#allocation15]  }
  0x65   :  { %v151_v10 = vmul.f32 %v149_v5, %v149_v5  ;;  %v152_v14 = vmul.f32 %v150_v6, %v150_v6  ;;  %377 = vlog2.f32 %v159_v9  ;;  %vm240_vm1 = vcmask 1041408   ;;  %s292_s17 = sshll.u32 %s603_s4, 4  ;;  %s293_s17 = int_to_ptr.vmem [resolvable:$true] %s292_s17 }
  0x66   :  { %379 = vlog2.f32 %v171_v12  ;;  %v222_v20 = vunpack.c.0.s8 %v221_v16  ;;  %vm267_vm2 = vcmask 1043456   ;;  %vm204_vm3 = vcmask 1040384   ;;  %s496_s3 = scalar_lea.vmem %s293_s17, 16  ;;  %s500_s30 = scalar_lea.vmem %s293_s17, 32 }
  0x67   :  { %381 = vlog2.f32 %v172_v13  ;;  %p497_p2 = scmp.ne.s32.totalorder %s293_s17, %s496_s3  ;;  %p501_p3 = scmp.lt.s32.totalorder %s293_s17, %s293_s17 }
  0x68   :  { %v153_v7 = vld [vmem:[#allocation2] sm:$0x3f]  ;;  %v154_v11 = vld [vmem:[#allocation2 + $0x8] sm:$0x3f]  ;;  %v225_v22 = vsub.s32 %v222_v20, %v224_v21  ;;  %p502_p4 = scmp.lt.s32.totalorder %s500_s30, %s496_s3 }
  0x69   :  { %v155_v18 = vadd.f32 %v153_v7, %v151_v10  ;;  %v156_v19 = vadd.f32 %v154_v11, %v152_v14  ;;  %v162_v27 = vld [vmem:[#allocation3] sm:$0x1] }
  0x6a   :  { %p503_p5 = por %p502_p4, %p501_p3 }
  0x6b   :  { %157 = vst [vmem:[#allocation2] sm:$0x3f] %v155_v18  ;;  %158 = vst [vmem:[#allocation2 + $0x8] sm:$0x3f] %v156_v19 }
  0x6c   :  { %p504_p6 = pnand %p503_p5, %p497_p2 }
  0x6e   :  { %v376_v23 = vpop.eup %375 }
  0x6f   :  { %v378_v24 = vpop.eup %377  ;;  %v167_v26 = vmul.f32 0.6931472, %v376_v23 }
  0x70   :  { %v380_v28 = vpop.eup %379  ;;  %v161_v31 = vmul.f32 0.6931472, %v378_v24 }
  0x71   :  { %v382_v32 = vpop.eup %381  ;;  %v219_v34 = vcombine.high %v167_v26, %v167_v26  ;;  %v226_v35 = vrot.slane %v167_v26, %v225_v22  ;;  %v174_v36 = vmul.f32 0.6931472, %v380_v28 }
  0x72   :  { %v186_v25 = vld [vmem:[#allocation2] sm:$0x3f]  ;;  %v187_v29 = vld [vmem:[#allocation2 + $0x8] sm:$0x3f]  ;;  %v163_v38 = vadd.f32 %v162_v27, %v161_v31  ;;  %v176_v39 = vmul.f32 0.6931472, %v382_v32 }
  0x73   :  { %v189_v30 = vsel %vm188_vm0, %v186_v25, 0.0  ;;  %v190_v33 = vsel %vm188_vm0, %v187_v29, 0.0  ;;  %v233_v40 = vrot.slane %v219_v34, %v225_v22  ;;  %v234_v41 = vcombine.high %v226_v35, %v226_v35 }
  0x74   :  { %v191_v37 = vadd.f32 %v190_v33, %v189_v30  ;;  %v241_v42 = vsel %vm240_vm1, %v226_v35, 0.0  ;;  %v263_v43 = vcombine.high %v174_v36, %v174_v36  ;;  %164 = vst [vmem:[#allocation3] sm:$0x1] %v163_v38  ;;  %v264_v44 = vcombine.high %v176_v39, %v176_v39 }
  0x75   :  { %v268_v45 = vsel %vm267_vm2, %v174_v36, 0.0  ;;  %v271_v46 = vsel %vm267_vm2, %v176_v39, 0.0  ;;  %v235_v47 = vcombine.high %v233_v40, %v233_v40  ;;  %v242_v48 = vsel %vm240_vm1, %v234_v41, 0.0 }
  0x76   :  { %192 = vadd.xlane.f32.xlu0 %v191_v37  ;;  %v244_v49 = vsel %vm240_vm1, %v233_v40, 0.0  ;;  %v269_v50 = vsel %vm267_vm2, %v263_v43, 0.0  ;;  %v243_v51 = vadd.f32 %v242_v48, %v241_v42  ;;  %v273_v56 = vsel %vm267_vm2, %v264_v44, 0.0 }
  0x77   :  { %v270_v52 = vadd.f32 %v269_v50, %v268_v45  ;;  %v246_v53 = vsel %vm240_vm1, %v235_v47, 0.0 }
  0x78   :  { %v245_v54 = vadd.f32 %v244_v49, %v243_v51 }
  0x79   :  { %v272_v55 = vadd.f32 %v271_v46, %v270_v52 }
  0x7a   :  { %v247_v57 = vadd.f32 %v246_v53, %v245_v54 }
  0x7b   :  { %v203_v58 = vld [vmem:[#allocation3] sm:$0x1]  ;;  %v274_v60 = vadd.f32 %v273_v56, %v272_v55 }
  0x7c   :  { %248 = vadd.xlane.f32.xlu1 %v247_v57  ;;  %v205_v59 = vsel %vm204_vm3, %v203_v58, 0.0 }
  0x7d   :  { %206 = vadd.xlane.f32.xlu0 %v205_v59 }
  0x80   :  { %275 = vadd.xlane.f32.xlu1 %v274_v60 }
 0x103   :  { %v193_v61 = vpop.xlane.xlu0 %192 }
 0x104   :  { %v194_v62 = vrot.slane %v193_v61, 4 }
 0x106   :  { %v195_v63 = vadd.f32 %v194_v62, %v193_v61 }
 0x108   :  { %v196_v0 = vrot.slane %v195_v63, 2 }
 0x109   :  { %v249_v2 = vpop.xlane.xlu1 %248 }
 0x10a   :  { %v197_v1 = vadd.f32 %v196_v0, %v195_v63  ;;  %v250_v3 = vrot.slane %v249_v2, 4  ;;  %v207_v4 = vpop.xlane.xlu0 %206 }
 0x10b   :  { %v208_v6 = vrot.slane %v207_v4, 4 }
 0x10c   :  { %v198_v5 = vrot.slane %v197_v1, 1  ;;  %v251_v7 = vadd.f32 %v250_v3, %v249_v2 }
 0x10d   :  { %v209_v9 = vadd.f32 %v208_v6, %v207_v4  ;;  %v276_v10 = vpop.xlane.xlu1 %275 }
 0x10e   :  { %v199_v8 = vadd.f32 %v198_v5, %v197_v1  ;;  %v252_v11 = vrot.slane %v251_v7, 2  ;;  %v277_v12 = vrot.slane %v276_v10, 4 }
 0x10f   :  { %v210_v13 = vrot.slane %v209_v9, 2 }
 0x110   :  { %356 = vpush %v199_v8  ;;  %v278_v14 = vadd.f32 %v277_v12, %v276_v10  ;;  %v253_v15 = vadd.f32 %v252_v11, %v251_v7 }
 0x111   :  { %v211_v16 = vadd.f32 %v210_v13, %v209_v9 }
 0x112   :  { %v279_v17 = vrot.slane %v278_v14, 2  ;;  %v254_v18 = vrot.slane %v253_v15, 1 }
 0x113   :  { %v212_v19 = vrot.slane %v211_v16, 1 }
 0x114   :  { %v280_v20 = vadd.f32 %v279_v17, %v278_v14  ;;  %v255_v21 = vadd.f32 %v254_v18, %v253_v15 }
 0x115   :  { %v213_v22 = vadd.f32 %v212_v19, %v211_v16 }
 0x116   :  { %v281_v23 = vrot.slane %v280_v20, 1 }
 0x117   :  { %358 = vpush %v213_v22 }
 0x118   :  { %360 = vpush %v255_v21  ;;  %v282_v24 = vadd.f32 %v281_v23, %v280_v20 }
 0x11a   :  { %362 = vpush %v282_v24 }
 0x141   :  { %s357_s18 = spop %356 }
 0x142   :  { %v201_v25 = vstv %s357_s18 }
 0x143   :  { %202 = vst [vmem:[#allocation15] sm:$0x1] %v201_v25 }
 0x144   :  { %507 = shalt.err (!%p504_p6)
}
 0x145   :  { %s508_s0 = scalar_lea.hbm %s786_s5, 16 }
 0x146   :  { %p509_p7 = scmp.ne.s32.totalorder %s786_s5, %s508_s0  ;;  %p512_p8 = scmp.lt.u32.totalorder %s508_s0, %s786_s5 }
 0x148   :  { %p514_p9 = pnand %p512_p8, %p509_p7 }
 0x14a   :  { %517 = shalt.err (!%p514_p9)
}
 0x14b   :  { %295 = dma.vmem_to_hbm [thread:$0]  %s293_s17, 16, %s786_s5, [#allocation8]  }
 0x14c   :  { %s604_s1 = smov [#allocation16]   ;;  %s605_s28 = smov [#allocation18]  }
 0x14d   :  { %s302_s27 = sshll.u32 %s604_s1, 4  ;;  %s312_s29 = sshll.u32 %s605_s28, 4  ;;  %s303_s27 = int_to_ptr.vmem [resolvable:$true] %s302_s27  ;;  %s729_s29 = int_to_ptr.vmem [resolvable:$true] %s312_s29 }
 0x14e   :  { %s359_s9 = spop %358  ;;  %s606_s10 = smov [#allocation19]  }
 0x14f   :  { %s322_s11 = sshll.u32 %s606_s10, 4  ;;  %v215_v26 = vstv %s359_s9  ;;  %s361_s12 = spop %360  ;;  %s731_s11 = int_to_ptr.vmem [resolvable:$true] %s322_s11 }
 0x150   :  { %216 = vst [vmem:[#allocation16] sm:$0x1] %v215_v26  ;;  %v257_v27 = vstv %s361_s12  ;;  %s363_s14 = spop %362  ;;  %s518_s5 = scalar_lea.vmem %s303_s27, 16 }
 0x151   :  { %258 = vst [vmem:[#allocation18] sm:$0x1] %v257_v27  ;;  %v284_v28 = vstv %s363_s14  ;;  %p519_p10 = scmp.ne.s32.totalorder %s303_s27, %s518_s5  ;;  %s522_s15 = scalar_lea.vmem %s303_s27, 32 }
 0x152   :  { %p523_p11 = scmp.lt.s32.totalorder %s303_s27, %s303_s27  ;;  %p524_p12 = scmp.lt.s32.totalorder %s522_s15, %s518_s5 }
 0x154   :  { %p525_p13 = por %p524_p12, %p523_p11 }
 0x156   :  { %p526_p0 = pnand %p525_p13, %p519_p10 }
 0x158   :  { %529 = shalt.err (!%p526_p0)
}
 0x159   :  { %s530_s13 = scalar_lea.hbm %s787_s6, 16 }
 0x15a   :  { %p531_p1 = scmp.ne.s32.totalorder %s787_s6, %s530_s13  ;;  %p534_p2 = scmp.lt.u32.totalorder %s530_s13, %s787_s6 }
 0x15c   :  { %p536_p3 = pnand %p534_p2, %p531_p1 }
 0x15e   :  { %539 = shalt.err (!%p536_p3)
}
 0x15f   :  { %305 = dma.vmem_to_hbm [thread:$0]  %s303_s27, 16, %s787_s6, [#allocation17]   ;;  %285 = vst [vmem:[#allocation19] sm:$0x1] %v284_v28 }
 0x160   :  { %s540_s20 = scalar_lea.vmem %s729_s29, 16  ;;  %s544_s0 = scalar_lea.vmem %s729_s29, 32 }
 0x161   :  { %p541_p4 = scmp.ne.s32.totalorder %s729_s29, %s540_s20  ;;  %p545_p5 = scmp.lt.s32.totalorder %s729_s29, %s729_s29 }
 0x162   :  { %p546_p6 = scmp.lt.s32.totalorder %s544_s0, %s540_s20 }
 0x164   :  { %p547_p7 = por %p546_p6, %p545_p5 }
 0x166   :  { %p548_p8 = pnand %p547_p7, %p541_p4 }
 0x168   :  { %551 = shalt.err (!%p548_p8)
}
 0x169   :  { %s552_s23 = scalar_lea.hbm %s788_s7, 16 }
 0x16a   :  { %p553_p9 = scmp.ne.s32.totalorder %s788_s7, %s552_s23  ;;  %p556_p10 = scmp.lt.u32.totalorder %s552_s23, %s788_s7 }
 0x16c   :  { %p558_p11 = pnand %p556_p10, %p553_p9 }
 0x16e   :  { %561 = shalt.err (!%p558_p11)
}
 0x16f   :  { %315 = dma.vmem_to_hbm [thread:$0]  %s729_s29, 16, %s788_s7, [#allocation17]  }
 0x170   :  { %s562_s28 = scalar_lea.vmem %s731_s11, 16  ;;  %s566_s9 = scalar_lea.vmem %s731_s11, 32 }
 0x171   :  { %p563_p12 = scmp.ne.s32.totalorder %s731_s11, %s562_s28  ;;  %p567_p13 = scmp.lt.s32.totalorder %s731_s11, %s731_s11 }
 0x172   :  { %p568_p0 = scmp.lt.s32.totalorder %s566_s9, %s562_s28 }
 0x174   :  { %p569_p1 = por %p568_p0, %p567_p13 }
 0x176   :  { %p570_p2 = pnand %p569_p1, %p563_p12 }
 0x178   :  { %573 = shalt.err (!%p570_p2)
}
 0x179   :  { %s574_s14 = scalar_lea.hbm %s789_s8, 16 }
 0x17a   :  { %p575_p3 = scmp.ne.s32.totalorder %s789_s8, %s574_s14  ;;  %p578_p4 = scmp.lt.u32.totalorder %s574_s14, %s789_s8 }
 0x17c   :  { %p580_p5 = pnand %p578_p4, %p575_p3 }
 0x17e   :  { %583 = shalt.err (!%p580_p5)
}
 0x17f   :  { %325 = dma.vmem_to_hbm [thread:$0]  %s731_s11, 16, %s789_s8, [#allocation20]  }
 0x180   :  { %590 = dma.done.wait [#allocation8], 16  }
 0x181   :  { %591 = vsyncadd [#allocation8], 4294967280 }
 0x182   :  { %592 = dma.done.wait [#allocation17], 32  }
 0x183   :  { %593 = vsyncadd [#allocation17], 4294967264 }
 0x184   :  { %594 = dma.done.wait [#allocation20], 16  }
 0x185   :  { %595 = vsyncadd [#allocation20], 4294967280 }
 0x186   :  { %338 = vsyncpa [#allocation7], 1 }
 0x187   :  { %339 = vsyncpa [#allocation10], 1 }
 0x188   :  { %340 = vsyncpa [#allocation13], 1 }
 0x189   :  { %341 = vsyncpa [#allocation8], 1 }
 0x18a   :  { %342 = vsyncpa [#allocation17], 1 }
 0x18b   :  { %343 = vsyncpa [#allocation20], 1 }

</bundles_post_ra>
